<compile_context>
chip_gen: v7x
topology: tpu7x:2x2x1
jax: 0.10.0
libtpu: 0.0.40
codegen_flags: <defaults>
</compile_context>

<pallas_src>
from functools import partial

import jax
import jax.numpy as jnp
from jax.experimental import pallas as pl
from jax.experimental.pallas import tpu as pltpu

LEAKY_SLOPE = 0.01  # nn.LeakyReLU default negative_slope


def _round_up(x, m):
    return ((x + m - 1) // m) * m


# ----------------------------------------------------------------------------
# K1: fused 1x1 conv (BN scale pre-folded into W) + bias + LeakyReLU
# ----------------------------------------------------------------------------
def _conv1x1_bias_lrelu_kernel(x_ref, w_ref, b_ref, o_ref):
    # x_ref: (TM, Cin_p) f32 -> cast in-register (no wrapper-side bf16 copy)
    x = x_ref[...].astype(jnp.bfloat16)
    y = jnp.dot(x, w_ref[...], preferred_element_type=jnp.float32) + b_ref[...]
    o_ref[...] = jnp.where(y > 0, y, LEAKY_SLOPE * y)


def conv1x1_bn_lrelu(x_nhwc, w, scale, bias, cout_pad=None):
    """LeakyReLU(BN(conv1x1(x))); output channels padded to `cout_pad`
    (padded lanes are exactly zero so downstream consumers can use them as-is)."""
    n, h, wd, cin = x_nhwc.shape
    cout = w.shape[1]
    coutp = _round_up(cout if cout_pad is None else cout_pad, 128)

    # BN scale folded into the conv weight (param prep, not hot path).
    w_folded = (w * scale[None, :]).astype(jnp.bfloat16)
    wp = jnp.pad(w_folded, ((0, 0), (0, coutp - cout)))
    bp = jnp.pad(bias, (0, coutp - cout)).reshape(1, coutp).astype(jnp.float32)

    M = n * h * wd
    cinp = _round_up(cin, 128)
    # Single grid step for small M (per-step overhead dominates on 1-TC chips);
    # otherwise tm = 512 (multiple of 256 -> full MXU row fill, >=2 steps on v7x).
    tm = _round_up(M, 8) if M <= 1024 else 512
    Mp = _round_up(M, tm)

    x2d = x_nhwc.reshape(M, cin)                 # contiguous NHWC -> free reshape
    if (Mp, cinp) != (M, cin):                   # skip pad copy when already aligned
        x2d = jnp.pad(x2d, ((0, Mp - M), (0, cinp - cin)))
        wp = jnp.pad(wp, ((0, cinp - cin), (0, 0)))

    out = pl.pallas_call(
        _conv1x1_bias_lrelu_kernel,
        out_shape=jax.ShapeDtypeStruct((Mp, coutp), jnp.float32),
        grid=(Mp // tm,),
        in_specs=[
            pl.BlockSpec((tm, cinp), lambda i: (i, 0)),
            pl.BlockSpec((cinp, coutp), lambda i: (0, 0)),
            pl.BlockSpec((1, coutp), lambda i: (0, 0)),
        ],
        out_specs=pl.BlockSpec((tm, coutp), lambda i: (i, 0)),
        compiler_params=pltpu.CompilerParams(dimension_semantics=("parallel",)),
    )(x2d, wp, bp)
    if Mp != M:
        out = out[:M]
    return out.reshape(n, h, wd, coutp)


# ----------------------------------------------------------------------------
# K2: fused [adaptive max pool (stages 0..2) + stages[-1] 1x1 conv/BN/lrelu +
#            channel concat (128-aligned slots) + SE grid-cell sums].
#     Only the (gpm_n^2, sum(slots)) cell-sum slab per batch leaves the kernel.
# ----------------------------------------------------------------------------
def _cells_from_map(p, gpm_n):
    # p: (oh, ow, c) value -> per grid-cell spatial sums (gpm_n^2, c)
    oh, ow, c = p.shape
    chh, cww = oh // gpm_n, ow // gpm_n
    cs = jnp.sum(p.reshape(gpm_n, chh, ow, c), axis=1)        # (gpm_n, ow, c)
    cs = jnp.sum(cs.reshape(gpm_n, gpm_n, cww, c), axis=2)    # (gpm_n, gpm_n, c)
    return cs.reshape(gpm_n * gpm_n, c)


def _pool_to_cells(x, oh, ow, gpm_n):
    # x: (h, w, c) value; adaptive max pool to (oh, ow), then grid-cell sums.
    # Dense reshape+reduce (no tiny sublane window slices in a Python loop).
    h, w, c = x.shape
    kh, kw = h // oh, w // ow
    p = jnp.max(x.reshape(oh, kh, w, c), axis=1) if kh > 1 else x.reshape(oh, w, c)
    p = jnp.max(p.reshape(oh, ow, kw, c), axis=2) if kw > 1 else p.reshape(oh, ow, c)
    return _cells_from_map(p, gpm_n)


def _cells_kernel(s0_ref, s1_ref, s2_ref, s3_ref, w3_ref, b3_ref, o_ref,
                  *, oh, ow, gpm_n, slots):
    g2 = gpm_n * gpm_n
    parts = []
    for ref, slot in ((s0_ref, slots[0]), (s1_ref, slots[1]), (s2_ref, slots[2])):
        cs = _pool_to_cells(ref[0], oh, ow, gpm_n)            # (g2, c)
        c = cs.shape[-1]
        if c < slot:                                          # pad slot in-register
            cs = jnp.concatenate(
                [cs, jnp.zeros((g2, slot - c), jnp.float32)], axis=-1)
        parts.append(cs)
    # stages[-1]: fused 1x1 conv (BN-folded weight) + bias + LeakyReLU, then
    # grid-cell sums (already at the target spatial size -> no pooling).
    x3 = s3_ref[0]                                            # (oh, ow, cin3)
    cin3 = x3.shape[-1]
    y3 = jnp.dot(x3.reshape(oh * ow, cin3).astype(jnp.bfloat16), w3_ref[...],
                 preferred_element_type=jnp.float32) + b3_ref[...]
    y3 = jnp.where(y3 > 0, y3, LEAKY_SLOPE * y3)              # (oh*ow, slots[3])
    parts.append(_cells_from_map(y3.reshape(oh, ow, slots[3]), gpm_n))
    # all slot widths are multiples of 128 -> one lane-dense store per grid step
    o_ref[...] = jnp.concatenate(parts, axis=-1).reshape(1, g2, sum(slots))


def cells_from_stages(s0, s1, s2p, s3_raw, w3_folded, b3, gpm_n, slots):
    n, oh, ow, _ = s3_raw.shape
    for s in (s0, s1, s2p):
        # TODO(synk): PyTorch adaptive_max_pool2d floor/ceil windows for
        #             non-divisible H,W not implemented (never hit by this model).
        assert s.shape[1] % oh == 0 and s.shape[2] % ow == 0, \
            "adaptive max pool fast path requires H,W divisible by target size"
    assert s2p.shape[-1] == slots[2]
    g2 = gpm_n * gpm_n
    cpad = sum(slots)

    w3p = jnp.pad(w3_folded,
                  ((0, 0), (0, slots[3] - w3_folded.shape[1]))).astype(jnp.bfloat16)
    b3p = jnp.pad(b3, (0, slots[3] - b3.shape[0])).reshape(1, slots[3]).astype(jnp.float32)

    return pl.pallas_call(
        partial(_cells_kernel, oh=oh, ow=ow, gpm_n=gpm_n, slots=tuple(slots)),
        out_shape=jax.ShapeDtypeStruct((n, g2, cpad), jnp.float32),
        grid=(n,),
        in_specs=[
            pl.BlockSpec((1,) + s0.shape[1:], lambda b: (b, 0, 0, 0)),
            pl.BlockSpec((1,) + s1.shape[1:], lambda b: (b, 0, 0, 0)),
            pl.BlockSpec((1,) + s2p.shape[1:], lambda b: (b, 0, 0, 0)),
            pl.BlockSpec((1,) + s3_raw.shape[1:], lambda b: (b, 0, 0, 0)),
            pl.BlockSpec(w3p.shape, lambda b: (0, 0)),
            pl.BlockSpec(b3p.shape, lambda b: (0, 0)),
        ],
        out_specs=pl.BlockSpec((1, g2, cpad), lambda b: (b, 0, 0)),
        compiler_params=pltpu.CompilerParams(dimension_semantics=("parallel",)),
    )(s0, s1, s2p, s3_raw, w3p, b3p)


# ----------------------------------------------------------------------------
# K3: batched SE excitation MLP + gate*cell_sum global-avg-pool + classifier FC
#     Single grid step for the whole batch (M = B*gpm_n^2 MXU rows).
# ----------------------------------------------------------------------------
def _se_fc_kernel(cells_ref, w1_ref, b1_ref, w2_ref, b2_ref, wfc_ref, o_ref,
                  *, inv_cell, inv_hw):
    n, g2, cpad = cells_ref.shape
    cs = cells_ref[...].reshape(n * g2, cpad)                 # all batches at once
    z = (cs * inv_cell).astype(jnp.bfloat16)                  # per-cell means
    e = jnp.dot(z, w1_ref[...], preferred_element_type=jnp.float32) + b1_ref[...]
    e = jnp.maximum(e, 0.0)
    e = jnp.dot(e.astype(jnp.bfloat16), w2_ref[...],
                preferred_element_type=jnp.float32) + b2_ref[...]
    gate = jax.nn.sigmoid(e)                                  # (n*g2, cpad)
    # global avg pool of the SE-scaled map: (1/HW) * sum_cells gate * cell_sum
    pooled = jnp.sum((gate * cs).reshape(n, g2, cpad), axis=1) * inv_hw   # (n, cpad)
    o_ref[...] = jnp.dot(pooled.astype(jnp.bfloat16), wfc_ref[...],
                         preferred_element_type=jnp.float32)  # (n, ncls_p)


def _place_rows(w, widths, slots):
    # scatter the first axis of w (ordered by concat stage) to 128-aligned slots
    blocks, off = [], 0
    for c, s in zip(widths, slots):
        blocks.append(jnp.pad(w[off:off + c], ((0, s - c), (0, 0))))
        off += c
    return jnp.concatenate(blocks, axis=0)


def _place_vec(v, widths, slots):
    blocks, off = [], 0
    for c, s in zip(widths, slots):
        blocks.append(jnp.pad(v[off:off + c], (0, s - c)))
        off += c
    return jnp.concatenate(blocks, axis=0)


def se_fc_from_cells(cells, w1, b1, w2, b2, w_fc, widths, slots, oh, ow, gpm_n):
    n, g2, cpad = cells.shape
    Cr = w1.shape[1]
    ncls = w_fc.shape[1]
    crp = _round_up(Cr, 128)
    nclsp = _round_up(ncls, 128)

    # scatter SE / FC weights to the 128-aligned slotted channel layout;
    # zero rows at padded lanes => padding never affects the logits.
    w1p = jnp.pad(_place_rows(w1, widths, slots),
                  ((0, 0), (0, crp - Cr))).astype(jnp.bfloat16)
    b1p = jnp.pad(b1, (0, crp - Cr)).reshape(1, crp).astype(jnp.float32)
    w2p = jnp.pad(_place_rows(w2.T, widths, slots).T,
                  ((0, crp - Cr), (0, 0))).astype(jnp.bfloat16)
    b2p = _place_vec(b2, widths, slots).reshape(1, cpad).astype(jnp.float32)
    wfcp = jnp.pad(_place_rows(w_fc, widths, slots),
                   ((0, 0), (0, nclsp - ncls))).astype(jnp.bfloat16)

    inv_cell = float(gpm_n * gpm_n) / float(oh * ow)   # 1 / (cell spatial size)
    inv_hw = 1.0 / float(oh * ow)                      # global avg pool factor

    out = pl.pallas_call(
        partial(_se_fc_kernel, inv_cell=inv_cell, inv_hw=inv_hw),
        out_shape=jax.ShapeDtypeStruct((n, nclsp), jnp.float32),
    )(cells, w1p, b1p, w2p, b2p, wfcp)
    return out[:, :ncls]


# ----------------------------------------------------------------------------
# Glue: synthetic deterministic "resnet" stem (external module in the original)
# ----------------------------------------------------------------------------
def synthetic_backbone(x_nchw, proj_ws, stage_hw):
    x = jnp.transpose(x_nchw, (0, 2, 3, 1))  # -> NHWC
    n, H, W, cin = x.shape
    stages = []
    for w, (sh, sw) in zip(proj_ws, stage_hw):
        fh, fw = H // sh, W // sw
        pooled = x.reshape(n, sh, fh, sw, fw, cin).mean(axis=(2, 4))
        feat = jax.nn.relu(jnp.einsum('nhwc,cd->nhwd', pooled, w))
        stages.append(feat.astype(jnp.float32))
    return stages


def fold_bn(gamma, beta, mean, var, eps=1e-5):
    scale = gamma / jnp.sqrt(var + eps)
    bias = beta - mean * scale
    return scale, bias


# ----------------------------------------------------------------------------
# Full forward (mirrors se_gpm2cls_v0_d.forward)
# ----------------------------------------------------------------------------
def se_gpm2cls_forward(x, params, stage_hw, gpm_n):
    # stages = self.backbone(x)[1:]
    stages = synthetic_backbone(x, params['backbone_ws'], stage_hw)

    widths = [stages[0].shape[-1], stages[1].shape[-1],
              params['scale0_w'].shape[1], params['scale1_w'].shape[1]]
    slots = [_round_up(c, 128) for c in widths]   # 128-aligned channel slots

    # stages[-2] = self.scale[0](stages[-2])   (K1; output pre-padded to its slot)
    s2 = conv1x1_bn_lrelu(stages[-2], params['scale0_w'],
                          params['scale0_s'], params['scale0_b'],
                          cout_pad=slots[2])

    # stages[-1] = self.scale[1](stages[-1]) is fused into K2 below.
    w3_folded = params['scale1_w'] * params['scale1_s'][None, :]

    # adaptive_max_pool2d x3 + torch.cat + SE cell sums (K2)
    cells = cells_from_stages(stages[0], stages[1], s2, stages[-1],
                              w3_folded, params['scale1_b'], gpm_n, slots)

    # se_gpm excitation + adaptive_avg_pool2d + flatten + fc2cls (K3)
    oh, ow = stages[-1].shape[1], stages[-1].shape[2]
    return se_fc_from_cells(cells, params['se_w1'], params['se_b1'],
                            params['se_w2'], params['se_b2'], params['fc_w'],
                            widths, slots, oh, ow, gpm_n)


# ----------------------------------------------------------------------------
if __name__ == "__main__":
    # Small shapes consistent with the module (channels scaled down 8x).
    in_channels = [32, 64, 128, 256]
    reduce2 = [64, 64]
    gpm_n = 2
    n_classes = 10
    B, H_img, W_img = 2, 128, 128
    stage_hw = [(32, 32), (16, 16), (8, 8), (4, 4)]   # H/4 .. H/32

    key = jax.random.PRNGKey(0)
    ks = jax.random.split(key, 20)

    def w_init(k, shape):
        return jax.random.normal(k, shape, jnp.float32) / jnp.sqrt(float(shape[0]))

    params = {}
    params['backbone_ws'] = [w_init(ks[i], (3, c)) for i, c in enumerate(in_channels)]

    # scale[0]: conv1x1 in_channels[-2] -> reduce2[0], BN, LeakyReLU
    params['scale0_w'] = w_init(ks[4], (in_channels[-2], reduce2[0]))
    g0 = 1.0 + 0.1 * jax.random.normal(ks[5], (reduce2[0],), jnp.float32)
    b0 = 0.1 * jax.random.normal(ks[6], (reduce2[0],), jnp.float32)
    m0 = 0.1 * jax.random.normal(ks[7], (reduce2[0],), jnp.float32)
    v0 = jax.random.uniform(ks[8], (reduce2[0],), jnp.float32, 0.5, 1.5)
    params['scale0_s'], params['scale0_b'] = fold_bn(g0, b0, m0, v0)

    # scale[1]: conv1x1 in_channels[-1] -> reduce2[1], BN, LeakyReLU
    params['scale1_w'] = w_init(ks[9], (in_channels[-1], reduce2[1]))
    g1 = 1.0 + 0.1 * jax.random.normal(ks[10], (reduce2[1],), jnp.float32)
    b1 = 0.1 * jax.random.normal(ks[11], (reduce2[1],), jnp.float32)
    m1 = 0.1 * jax.random.normal(ks[12], (reduce2[1],), jnp.float32)
    v1 = jax.random.uniform(ks[13], (reduce2[1],), jnp.float32, 0.5, 1.5)
    params['scale1_s'], params['scale1_b'] = fold_bn(g1, b1, m1, v1)

    # se_gpm / fc2cls operate on sum(in_channels[:-1]) channels (== concat width)
    C = int(sum(in_channels[:-1]))          # 32 + 64 + 128 = 224
    Cr = max(C // 16, 1)
    params['se_w1'] = w_init(ks[14], (C, Cr))
    params['se_b1'] = 0.1 * jax.random.normal(ks[15], (Cr,), jnp.float32)
    params['se_w2'] = w_init(ks[16], (Cr, C))
    params['se_b2'] = 0.1 * jax.random.normal(ks[17], (C,), jnp.float32)
    params['fc_w'] = w_init(ks[18], (C, n_classes))   # nn.Linear(C, n_classes, bias=False)^T

    x = jax.random.normal(ks[19], (B, 3, H_img, W_img), jnp.float32)

    out = jax.block_until_ready(se_gpm2cls_forward(x, params, stage_hw, gpm_n))

    assert out.shape == (B, n_classes), out.shape
    assert bool(jnp.all(jnp.isfinite(out)))
    print("KERNEL_OK")
</pallas_src>

<mosaic_0001>
module attributes {stable_mosaic.version = 11 : i64} {
  func.func @_conv1x1_bias_lrelu_kernel(%arg0: i32, %arg1: memref<128x128xf32, #tpu.memory_space<vmem>>, %arg2: memref<128x128xbf16, #tpu.memory_space<vmem>>, %arg3: memref<1x128xf32, #tpu.memory_space<vmem>>, %arg4: memref<128x128xf32, #tpu.memory_space<vmem>>) attributes {dimension_semantics = [#tpu.dimension_semantics<parallel>], iteration_bounds = array<i64: 1>, scalar_prefetch = 0 : i64, scratch_operands = 0 : i64, tpu.core_type = #tpu.core_type<tc>, window_params = [{transform_indices = @transform_0, window_bounds = array<i64: 128, 128>}, {pipeline_mode = #tpu.pipeline_mode<synchronous>, transform_indices = @transform_1, window_bounds = array<i64: 128, 128>}, {pipeline_mode = #tpu.pipeline_mode<synchronous>, transform_indices = @transform_2, window_bounds = array<i64: 1, 128>}, {transform_indices = @transform_3, window_bounds = array<i64: 128, 128>}]} {
    %c0 = arith.constant 0 : index
    %c0_0 = arith.constant 0 : index
    %0 = vector.load %arg1[%c0, %c0_0] : memref<128x128xf32, #tpu.memory_space<vmem>>, vector<128x128xf32>
    %1 = arith.truncf %0 : vector<128x128xf32> to vector<128x128xbf16>
    %c0_1 = arith.constant 0 : index
    %c0_2 = arith.constant 0 : index
    %2 = vector.load %arg2[%c0_1, %c0_2] : memref<128x128xbf16, #tpu.memory_space<vmem>>, vector<128x128xbf16>
    %cst = arith.constant dense<0.000000e+00> : vector<128x128xf32>
    %3 = tpu.matmul %1, %2, %cst {dimension_numbers = #tpu.dot_dimension_numbers<[1], [0], [0], [1], [0, 0, 1, 1], [], []>} : vector<128x128xbf16>, vector<128x128xbf16>, vector<128x128xf32> -> vector<128x128xf32>
    %c0_3 = arith.constant 0 : index
    %c0_4 = arith.constant 0 : index
    %4 = vector.load %arg3[%c0_3, %c0_4] : memref<1x128xf32, #tpu.memory_space<vmem>>, vector<1x128xf32>
    %5 = vector.broadcast %4 : vector<1x128xf32> to vector<128x128xf32>
    %6 = arith.addf %3, %5 : vector<128x128xf32>
    %cst_5 = arith.constant 0.000000e+00 : f32
    %7 = vector.broadcast %cst_5 : f32 to vector<128x128xf32>
    %8 = arith.cmpf ogt, %6, %7 : vector<128x128xf32>
    %cst_6 = arith.constant 0.00999999977 : f32
    %9 = vector.broadcast %cst_6 : f32 to vector<128x128xf32>
    %10 = arith.mulf %9, %6 : vector<128x128xf32>
    %11 = arith.select %8, %6, %10 : vector<128x128xi1>, vector<128x128xf32>
    %c0_7 = arith.constant 0 : index
    %c0_8 = arith.constant 0 : index
    %12 = vector.load %arg4[%c0_7, %c0_8] : memref<128x128xf32, #tpu.memory_space<vmem>>, vector<128x128xf32>
    tpu.vector_store %arg4[%c0_7, %c0_8], %11 {strides = array<i32>} : memref<128x128xf32, #tpu.memory_space<vmem>>, vector<128x128xf32>,
    return
  }
  func.func @transform_0(%arg0: i32) -> (i32, i32) {
    %c0_i32 = arith.constant 0 : i32
    %c0_i32_0 = arith.constant 0 : i32
    return %arg0, %c0_i32 : i32, i32
  }
  func.func @transform_1(%arg0: i32) -> (i32, i32) {
    %c0_i32 = arith.constant 0 : i32
    %c0_i32_0 = arith.constant 0 : i32
    %c0_i32_1 = arith.constant 0 : i32
    return %c0_i32, %c0_i32_0 : i32, i32
  }
  func.func @transform_2(%arg0: i32) -> (i32, i32) {
    %c0_i32 = arith.constant 0 : i32
    %c0_i32_0 = arith.constant 0 : i32
    %c0_i32_1 = arith.constant 0 : i32
    return %c0_i32, %c0_i32_0 : i32, i32
  }
  func.func @transform_3(%arg0: i32) -> (i32, i32) {
    %c0_i32 = arith.constant 0 : i32
    %c0_i32_0 = arith.constant 0 : i32
    return %arg0, %c0_i32 : i32, i32
  }
}

</mosaic_0001>

<bundles_post_ra>
// kernel: tpu_custom_call.1
= control target key start
LH: loop header
LB: loop body
LE: loop exit
PB: predicated region body
PF: predicated region fallthrough
CT: control target
= control target key end

     0   :  { %8 = vsyncpa [#allocation3], 0  ;;  %s568_s0 = inlined_call_operand.hbm [shape: f32[128,128], index: 0, kind: input, shape index: {}]   ;;  %s569_s1 = inlined_call_operand.hbm [shape: bf16[128,128], index: 1, kind: input, shape index: {}]   ;;  %s570_s2 = inlined_call_operand.vmem [shape: f32[1,128], index: 2, kind: input, shape index: {}]   ;;  %s571_s3 = inlined_call_operand.hbm [shape: f32[128,128], index: 3, kind: output, shape index: {}]  }
   0x1   :  { %9 = vsyncpa [#allocation6], 0 }
   0x2   :  { %10 = vsyncpa [#allocation4], 0  ;;  %s478_s12 = smov [#allocation2]   ;;  %s406_s16 = scalar_lea.hbm %s568_s0, 2048 }
   0x3   :  { %s16_s13 = sshll.u32 %s478_s12, 4  ;;  %p407_p0 = scmp.ne.s32.totalorder %s568_s0, %s406_s16  ;;  %s17_s13 = int_to_ptr.vmem [resolvable:$true] %s16_s13 }
   0x4   :  { %p410_p1 = scmp.lt.u32.totalorder %s406_s16, %s568_s0 }
   0x6   :  { %p412_p2 = pnand %p410_p1, %p407_p0 }
   0x8   :  { %415 = shalt.err (!%p412_p2)
}
   0x9   :  { %s416_s21 = scalar_lea.vmem %s17_s13, 2048  ;;  %p421_p4 = scmp.lt.s32.totalorder %s17_s13, %s17_s13 }
   0xa   :  { %p417_p3 = scmp.ne.s32.totalorder %s17_s13, %s416_s21  ;;  %p422_p5 = scmp.lt.s32.totalorder %s416_s21, %s416_s21 }
   0xc   :  { %p423_p6 = por %p422_p5, %p421_p4 }
   0xe   :  { %p424_p7 = pnand %p423_p6, %p417_p3 }
  0x10   :  { %427 = shalt.err (!%p424_p7)
}
  0x11   :  { %s479_s22 = smov 128   ;;  %s480_s23 = smov 8  }
  0x12   :  { %22 = dma.hbm_to_vmem [thread:$0]  %s568_s0, 2048, %s17_s13, [#allocation3], %s479_s22, %s479_s22, %s480_s23  }
  0x13   :  { %s481_s26 = smov [#allocation5]   ;;  %s428_s30 = scalar_lea.hbm %s569_s1, 1024 }
  0x14   :  { %s28_s27 = sshll.u32 %s481_s26, 4  ;;  %p429_p8 = scmp.ne.s32.totalorder %s569_s1, %s428_s30  ;;  %s29_s27 = int_to_ptr.vmem [resolvable:$true] %s28_s27 }
  0x15   :  { %p432_p9 = scmp.lt.u32.totalorder %s428_s30, %s569_s1 }
  0x17   :  { %p434_p10 = pnand %p432_p9, %p429_p8 }
  0x19   :  { %437 = shalt.err (!%p434_p10)
}
  0x1a   :  { %s438_s8 = scalar_lea.vmem %s29_s27, 1024  ;;  %p443_p12 = scmp.lt.s32.totalorder %s29_s27, %s29_s27 }
  0x1b   :  { %p439_p11 = scmp.ne.s32.totalorder %s29_s27, %s438_s8  ;;  %p444_p13 = scmp.lt.s32.totalorder %s438_s8, %s438_s8 }
  0x1d   :  { %p445_p0 = por %p444_p13, %p443_p12 }
  0x1f   :  { %p446_p1 = pnand %p445_p0, %p439_p11 }
  0x21   :  { %449 = shalt.err (!%p446_p1)
}
  0x22   :  { %s482_s0 = smov 64   ;;  %s483_s9 = smov 4  }
  0x23   :  { %34 = dma.hbm_to_vmem [thread:$0]  %s569_s1, 1024, %s29_s27, [#allocation6], %s482_s0, %s482_s0, %s483_s9  }
  0x24   :  { %472 = dma.done.wait [#allocation3], 2048  }
  0x25   :  { %473 = vsyncadd [#allocation3], 4294965248 }
  0x26   :  { %474 = dma.done.wait [#allocation6], 1024  }
  0x27   :  { %475 = vsyncadd [#allocation6], 4294966272  ;;  %v398_v0 = vld [vmem:[#allocation5] sm:$0xff]   ;;  %v399_v1 = vld [vmem:[#allocation5 + $0x8] sm:$0xff]  }
  0x28   :  { %343 = vmatprep.subr.bf16.mxu0 %v398_v0  ;;  %375 = vmatprep.subr.bf16.mxu1 %v398_v0  ;;  %v400_v2 = vld [vmem:[#allocation5 + $0x10] sm:$0xff]   ;;  %v401_v3 = vld [vmem:[#allocation5 + $0x18] sm:$0xff]   ;;  %v44_v4 = vld [vmem:[#allocation2] sm:$0xff] }
  0x29   :  { %344 = vmatpush3.bf16.msra.mxu0 %v398_v0  ;;  %383 = vmatpush3.bf16.msra.mxu1 %v398_v0  ;;  %v45_v5 = vld [vmem:[#allocation2 + $0x8] sm:$0xff]  ;;  %v52_v6 = vld [vmem:[#allocation2 + $0x40] sm:$0xff]  ;;  %v404_v12 = vld [vmem:[#allocation5 + $0x30] sm:$0xff]  }
  0x2a   :  { %345 = vmatprep.subr.bf16.mxu0 %v399_v1  ;;  %376 = vmatprep.subr.bf16.mxu1 %v399_v1  ;;  %v60_v7 = vpack.c.bf16 %v45_v5, %v44_v4  ;;  %v53_v8 = vld [vmem:[#allocation2 + $0x48] sm:$0xff]  ;;  %v402_v10 = vld [vmem:[#allocation5 + $0x20] sm:$0xff]   ;;  %v405_v13 = vld [vmem:[#allocation5 + $0x38] sm:$0xff]  }
  0x2b   :  { %v64_v9 = vpack.c.bf16 %v53_v8, %v52_v6  ;;  %v403_v11 = vld [vmem:[#allocation5 + $0x28] sm:$0xff]   ;;  %v46_v14 = vld [vmem:[#allocation2 + $0x10] sm:$0xff]  ;;  %v47_v15 = vld [vmem:[#allocation2 + $0x18] sm:$0xff] }
  0x2c   :  { %359 = vmatprep.mubr.bf16.mxu0 %v60_v7  ;;  %v54_v16 = vld [vmem:[#allocation2 + $0x50] sm:$0xff]  ;;  %v55_v17 = vld [vmem:[#allocation2 + $0x58] sm:$0xff]  ;;  %v48_v18 = vld [vmem:[#allocation2 + $0x20] sm:$0xff]  ;;  %v61_v22 = vpack.c.bf16 %v47_v15, %v46_v14 }
  0x2d   :  { %346 = vmatpush3.bf16.msra.mxu0 %v399_v1  ;;  %384 = vmatpush3.bf16.msra.mxu1 %v399_v1  ;;  %v49_v19 = vld [vmem:[#allocation2 + $0x28] sm:$0xff]  ;;  %v56_v20 = vld [vmem:[#allocation2 + $0x60] sm:$0xff]  ;;  %v65_v23 = vpack.c.bf16 %v55_v17, %v54_v16  ;;  %v50_v26 = vld [vmem:[#allocation2 + $0x30] sm:$0xff] }
  0x2e   :  { %347 = vmatprep.subr.bf16.mxu0 %v400_v2  ;;  %377 = vmatprep.subr.bf16.mxu1 %v400_v2  ;;  %v57_v21 = vld [vmem:[#allocation2 + $0x68] sm:$0xff]  ;;  %v62_v24 = vpack.c.bf16 %v49_v19, %v48_v18  ;;  %v51_v27 = vld [vmem:[#allocation2 + $0x38] sm:$0xff]  ;;  %v58_v28 = vld [vmem:[#allocation2 + $0x70] sm:$0xff] }
  0x2f   :  { %367 = vmatprep.mubr.bf16.mxu1 %v64_v9  ;;  %v66_v25 = vpack.c.bf16 %v57_v21, %v56_v20  ;;  %v59_v29 = vld [vmem:[#allocation2 + $0x78] sm:$0xff]  ;;  %v63_v30 = vpack.c.bf16 %v51_v27, %v50_v26  ;;  %v535_v32 = vld [vmem:[%s570_s2] ss:$0 sm:$0xff]  ;;  %s484_s2 = smov [#allocation7]  }
  0x30   :  { %v67_v31 = vpack.c.bf16 %v59_v29, %v58_v28  ;;  %s305_s13 = sshll.u32 %s484_s2, 4  ;;  %s306_s13 = int_to_ptr.vmem [resolvable:$true] %s305_s13 }
  0x31   :  { %348 = vmatpush3.bf16.msra.mxu0 %v400_v2  ;;  %385 = vmatpush3.bf16.msra.mxu1 %v400_v2  ;;  %s450_s14 = scalar_lea.vmem %s306_s13, 2048  ;;  %p455_p3 = scmp.lt.s32.totalorder %s306_s13, %s306_s13 }
  0x32   :  { %349 = vmatprep.subr.bf16.mxu0 %v401_v3  ;;  %378 = vmatprep.subr.bf16.mxu1 %v401_v3  ;;  %p451_p2 = scmp.ne.s32.totalorder %s306_s13, %s450_s14  ;;  %p456_p4 = scmp.lt.s32.totalorder %s450_s14, %s450_s14 }
  0x34   :  { %p457_p5 = por %p456_p4, %p455_p3 }
  0x35   :  { %350 = vmatpush3.bf16.msra.mxu0 %v401_v3  ;;  %386 = vmatpush3.bf16.msra.mxu1 %v401_v3 }
  0x36   :  { %351 = vmatprep.subr.bf16.mxu0 %v402_v10  ;;  %379 = vmatprep.subr.bf16.mxu1 %v402_v10  ;;  %p458_p6 = pnand %p457_p5, %p451_p2 }
  0x39   :  { %352 = vmatpush3.bf16.msra.mxu0 %v402_v10  ;;  %387 = vmatpush3.bf16.msra.mxu1 %v402_v10 }
  0x3a   :  { %353 = vmatprep.subr.bf16.mxu0 %v403_v11  ;;  %380 = vmatprep.subr.bf16.mxu1 %v403_v11 }
  0x3d   :  { %354 = vmatpush3.bf16.msra.mxu0 %v403_v11  ;;  %388 = vmatpush3.bf16.msra.mxu1 %v403_v11 }
  0x3e   :  { %355 = vmatprep.subr.bf16.mxu0 %v404_v12  ;;  %381 = vmatprep.subr.bf16.mxu1 %v404_v12 }
  0x41   :  { %356 = vmatpush3.bf16.msra.mxu0 %v404_v12  ;;  %389 = vmatpush3.bf16.msra.mxu1 %v404_v12 }
  0x42   :  { %357 = vmatprep.subr.bf16.mxu0 %v405_v13  ;;  %382 = vmatprep.subr.bf16.mxu1 %v405_v13 }
  0x45   :  { %358 = vmatpush3.bf16.msra.mxu0 %v405_v13  ;;  %390 = vmatpush3.bf16.msra.mxu1 %v405_v13 }
  0x48   :  { %360 = vmatmul.mubr.bf16.vlgmr.msra.gmra.mrb[0].mxu0 %v61_v22  ;;  %368 = vmatmul.mubr.bf16.vlgmr.msra.gmra.mrb[0].mxu1 %v65_v23 }
  0x49   :  { %363 = vmatprep.mubr.bf16.mxu0 %v62_v24  ;;  %371 = vmatprep.mubr.bf16.mxu1 %v66_v25 }
  0x50   :  { %364 = vmatmul.mubr.bf16.gmra.mrb[4].mxu0 %v63_v30  ;;  %372 = vmatmul.mubr.bf16.gmra.mrb[4].mxu1 %v67_v31 }
 0x11b   :  { %v361_v33 = vpop.f32.mrb[0].mxu0  ;;  %v369_v34 = vpop.f32.mrb[0].mxu1 }
 0x11c   :  { %v182_v35 = vadd.f32 %v361_v33, %v535_v32  ;;  %v214_v36 = vadd.f32 %v369_v34, %v535_v32  ;;  %v173_v37 = vpop.f32.mrb[1].mxu0  ;;  %v205_v38 = vpop.f32.mrb[1].mxu1 }
 0x11d   :  { %v174_v39 = vadd.f32 %v535_v32, %v173_v37  ;;  %v206_v40 = vadd.f32 %v535_v32, %v205_v38  ;;  %v362_v41 = vpop.f32.mrb[2].mxu0  ;;  %v370_v42 = vpop.f32.mrb[2].mxu1 }
 0x11e   :  { %vm238_vm0 = vcmp.gt.f32.partialorder %v182_v35, 0.0  ;;  %v254_v43 = vmul.f32 0.01, %v182_v35  ;;  %vm246_vm1 = vcmp.gt.f32.partialorder %v214_v36, 0.0  ;;  %v262_v44 = vmul.f32 0.01, %v214_v36 }
 0x11f   :  { %vm236_vm2 = vcmp.gt.f32.partialorder %v174_v39, 0.0  ;;  %v252_v45 = vmul.f32 0.01, %v174_v39  ;;  %vm244_vm3 = vcmp.gt.f32.partialorder %v206_v40, 0.0  ;;  %v260_v46 = vmul.f32 0.01, %v206_v40 }
 0x120   :  { %v270_v47 = vsel %vm238_vm0, %v182_v35, %v254_v43  ;;  %v278_v48 = vsel %vm246_vm1, %v214_v36, %v262_v44  ;;  %v185_v49 = vadd.f32 %v362_v41, %v535_v32  ;;  %v217_v50 = vadd.f32 %v370_v42, %v535_v32  ;;  %v176_v51 = vpop.f32.mrb[3].mxu0  ;;  %v208_v52 = vpop.f32.mrb[3].mxu1 }
 0x121   :  { %286 = vst [vmem:[#allocation7 + $0x10] sm:$0xff] %v270_v47  ;;  %294 = vst [vmem:[#allocation7 + $0x50] sm:$0xff] %v278_v48  ;;  %v268_v53 = vsel %vm236_vm2, %v174_v39, %v252_v45  ;;  %v276_v54 = vsel %vm244_vm3, %v206_v40, %v260_v46  ;;  %v177_v55 = vadd.f32 %v535_v32, %v176_v51 }
 0x122   :  { %v209_v56 = vadd.f32 %v535_v32, %v208_v52  ;;  %284 = vst [vmem:[#allocation7] sm:$0xff] %v268_v53  ;;  %292 = vst [vmem:[#allocation7 + $0x40] sm:$0xff] %v276_v54  ;;  %vm239_vm4 = vcmp.gt.f32.partialorder %v185_v49, 0.0  ;;  %v255_v57 = vmul.f32 0.01, %v185_v49  ;;  %vm247_vm5 = vcmp.gt.f32.partialorder %v217_v50, 0.0 }
 0x123   :  { %v263_v58 = vmul.f32 0.01, %v217_v50  ;;  %vm237_vm6 = vcmp.gt.f32.partialorder %v177_v55, 0.0  ;;  %v253_v59 = vmul.f32 0.01, %v177_v55  ;;  %v365_v63 = vpop.f32.mrb[4].mxu0 }
 0x124   :  { %vm245_vm7 = vcmp.gt.f32.partialorder %v209_v56, 0.0  ;;  %v261_v60 = vmul.f32 0.01, %v209_v56  ;;  %v271_v61 = vsel %vm239_vm4, %v185_v49, %v255_v57  ;;  %v373_v0 = vpop.f32.mrb[4].mxu1  ;;  %v198_v3 = vadd.f32 %v365_v63, %v535_v32  ;;  %v189_v5 = vpop.f32.mrb[5].mxu0 }
 0x125   :  { %v279_v62 = vsel %vm247_vm5, %v217_v50, %v263_v58  ;;  %287 = vst [vmem:[#allocation7 + $0x18] sm:$0xff] %v271_v61  ;;  %v269_v1 = vsel %vm237_vm6, %v177_v55, %v253_v59  ;;  %v230_v4 = vadd.f32 %v373_v0, %v535_v32  ;;  %v221_v6 = vpop.f32.mrb[5].mxu1  ;;  %v190_v7 = vadd.f32 %v535_v32, %v189_v5  ;;  %v366_v9 = vpop.f32.mrb[6].mxu0 }
 0x126   :  { %295 = vst [vmem:[#allocation7 + $0x58] sm:$0xff] %v279_v62  ;;  %v277_v2 = vsel %vm245_vm7, %v209_v56, %v261_v60  ;;  %285 = vst [vmem:[#allocation7 + $0x8] sm:$0xff] %v269_v1  ;;  %v222_v8 = vadd.f32 %v535_v32, %v221_v6  ;;  %v374_v10 = vpop.f32.mrb[6].mxu1  ;;  %vm242_vm8 = vcmp.gt.f32.partialorder %v198_v3, 0.0  ;;  %v258_v11 = vmul.f32 0.01, %v198_v3 }
 0x127   :  { %293 = vst [vmem:[#allocation7 + $0x48] sm:$0xff] %v277_v2  ;;  %vm250_vm9 = vcmp.gt.f32.partialorder %v230_v4, 0.0  ;;  %v266_v12 = vmul.f32 0.01, %v230_v4  ;;  %vm240_vm10 = vcmp.gt.f32.partialorder %v190_v7, 0.0  ;;  %v201_v17 = vadd.f32 %v366_v9, %v535_v32  ;;  %v192_v19 = vpop.f32.mrb[7].mxu0 }
 0x128   :  { %v256_v13 = vmul.f32 0.01, %v190_v7  ;;  %vm248_vm11 = vcmp.gt.f32.partialorder %v222_v8, 0.0  ;;  %v264_v14 = vmul.f32 0.01, %v222_v8  ;;  %v274_v15 = vsel %vm242_vm8, %v198_v3, %v258_v11  ;;  %v224_v20 = vpop.f32.mrb[7].mxu1 }
 0x129   :  { %v282_v16 = vsel %vm250_vm9, %v230_v4, %v266_v12  ;;  %v233_v18 = vadd.f32 %v374_v10, %v535_v32  ;;  %290 = vst [vmem:[#allocation7 + $0x30] sm:$0xff] %v274_v15  ;;  %v193_v23 = vadd.f32 %v535_v32, %v192_v19  ;;  %v225_v24 = vadd.f32 %v535_v32, %v224_v20 }
 0x12a   :  { %298 = vst [vmem:[#allocation7 + $0x70] sm:$0xff] %v282_v16  ;;  %v272_v21 = vsel %vm240_vm10, %v190_v7, %v256_v13  ;;  %v280_v22 = vsel %vm248_vm11, %v222_v8, %v264_v14  ;;  %vm243_vm12 = vcmp.gt.f32.partialorder %v201_v17, 0.0  ;;  %v259_v25 = vmul.f32 0.01, %v201_v17 }
 0x12b   :  { %288 = vst [vmem:[#allocation7 + $0x20] sm:$0xff] %v272_v21  ;;  %296 = vst [vmem:[#allocation7 + $0x60] sm:$0xff] %v280_v22  ;;  %vm251_vm13 = vcmp.gt.f32.partialorder %v233_v18, 0.0  ;;  %v267_v26 = vmul.f32 0.01, %v233_v18  ;;  %vm241_vm14 = vcmp.gt.f32.partialorder %v193_v23, 0.0 }
 0x12c   :  { %v257_v27 = vmul.f32 0.01, %v193_v23  ;;  %vm249_vm15 = vcmp.gt.f32.partialorder %v225_v24, 0.0  ;;  %v265_v28 = vmul.f32 0.01, %v225_v24  ;;  %v275_v29 = vsel %vm243_vm12, %v201_v17, %v259_v25 }
 0x12d   :  { %v283_v30 = vsel %vm251_vm13, %v233_v18, %v267_v26  ;;  %291 = vst [vmem:[#allocation7 + $0x38] sm:$0xff] %v275_v29 }
 0x12e   :  { %299 = vst [vmem:[#allocation7 + $0x78] sm:$0xff] %v283_v30  ;;  %v273_v31 = vsel %vm241_vm14, %v193_v23, %v257_v27  ;;  %v281_v33 = vsel %vm249_vm15, %v225_v24, %v265_v28 }
 0x12f   :  { %289 = vst [vmem:[#allocation7 + $0x28] sm:$0xff] %v273_v31  ;;  %297 = vst [vmem:[#allocation7 + $0x68] sm:$0xff] %v281_v33 }
 0x130   :  { %461 = shalt.err (!%p458_p6)
}
 0x131   :  { %s462_s17 = scalar_lea.hbm %s571_s3, 2048 }
 0x132   :  { %p463_p7 = scmp.ne.s32.totalorder %s571_s3, %s462_s17  ;;  %p466_p8 = scmp.lt.u32.totalorder %s462_s17, %s571_s3 }
 0x134   :  { %p468_p9 = pnand %p466_p8, %p463_p7 }
 0x136   :  { %471 = shalt.err (!%p468_p9)
}
 0x137   :  { %311 = dma.vmem_to_hbm [thread:$0]  %s306_s13, 2048, %s571_s3, [#allocation4], %s479_s22, %s479_s22, %s480_s23  }
 0x138   :  { %476 = dma.done.wait [#allocation4], 2048  }
 0x139   :  { %477 = vsyncadd [#allocation4], 4294965248 }
 0x13a   :  { %315 = vsyncpa [#allocation3], 1 }
 0x13b   :  { %316 = vsyncpa [#allocation6], 1 }
 0x13c   :  { %317 = vsyncpa [#allocation4], 1 }

</bundles_post_ra>
